<compile_context>
chip_gen: v7x
topology: tpu7x:2x2x1
jax: 0.10.0
libtpu: 0.0.40
codegen_flags: <defaults>
</compile_context>

<pallas_src>
import functools

import jax
import jax.numpy as jnp
from jax.experimental import pallas as pl
from jax.experimental.pallas import tpu as pltpu

LANE = 128


def _choose_tiling(N, C, L, itemsize):
    """Pick spatial sublane tile TS, number of spatial blocks, vmem limit."""
    try:
        kind = jax.devices()[0].device_kind.lower()
    except Exception:  # e.g. interpret mode / no TPU backend
        kind = ""
    if "v7" in kind:
        # v7x: 64 MiB VMEM per TensorCore, in-kernel f32 temporaries ~4-5x tile.
        budget, vmem_limit = 2 << 20, 40 * 1024 * 1024
    else:
        # v5e / v6e: 128 MiB VMEM -> amortize the ~0.35us per-step overhead.
        budget, vmem_limit = 4 << 20, 64 * 1024 * 1024

    # Sublane packing multiple of the input dtype (8 f32, 16 bf16, 32 int8).
    pack = max(8, 32 // max(1, itemsize))

    if L <= pack:
        return L, 1, vmem_limit

    # VMEM budget cap (budget counts the f32 compute tile per input).
    cap = max(pack, (budget // (C * LANE * 4)) // pack * pack)

    # Expose >= ~4 total grid steps so megacore / v7x's 2 TCs stay busy.
    want_j = max(1, -(-4 // N))                      # ceil(4 / N)
    ts_par = -(-L // want_j)                         # ceil(L / want_j)
    ts_par = max(pack, -(-ts_par // pack) * pack)    # round up to pack

    TS = min(cap, ts_par)
    if TS >= L:
        TS = L                                       # single full-extent block
    n_j = -(-L // TS)
    return TS, n_j, vmem_limit


def _ft_dense_kernel(pred_ref, targ_ref, out_ref, *, n_rows, tile_rows):
    """One (batch, spatial-tile) block with dense (possibly soft) targets.

    pred_ref, targ_ref : (1, C, TS, 128) tiles, native dtype (cast in-kernel)
    out_ref            : (1, 1, 2, 128) lane-dense partials:
                         row 0 = sum softmax(x) * t   (TP partial)
                         row 1 = sum t                (sum_t partial)
    """
    x = pred_ref[...]                                    # (1, C, TS, L) native
    t = targ_ref[...]

    if n_rows % tile_rows:                               # static: ragged last tile
        j = pl.program_id(1)
        row = jax.lax.broadcasted_iota(jnp.int32, (1, 1, tile_rows, LANE), 2)
        valid = (j * tile_rows + row) < n_rows           # (1,1,TS,L)
        x = jnp.where(valid, x, 0)                       # kill garbage rows
        t = jnp.where(valid, t, 0)

    # Softmax over channels (leading untiled dim -> pure VPU reductions).
    m = jnp.max(x, axis=1, keepdims=True)                # native dtype
    e = jnp.exp((x - m).astype(jnp.float32))             # (1, C, TS, L) f32
    denom = jnp.sum(e, axis=1, keepdims=True)            # (1, 1, TS, L)
    t32 = t.astype(jnp.float32)
    num_tp = jnp.sum(e * t32, axis=1, keepdims=True)     # (1, 1, TS, L)
    sum_t = jnp.sum(t32, axis=1, keepdims=True)          # (1, 1, TS, L)

    p_tp = num_tp * pl.reciprocal(denom, approx=False)   # softmax * t

    # Reduce the spatial sublane axis -> lane-dense (1, 128) rows; single store.
    tp_row = jnp.sum(p_tp[0, 0], axis=0, keepdims=True)  # (1, L)
    st_row = jnp.sum(sum_t[0, 0], axis=0, keepdims=True) # (1, L)
    out_ref[...] = jnp.concatenate([tp_row, st_row], axis=0).reshape(1, 1, 2, LANE)


def _ft_labels_kernel(pred_ref, lab_ref, out_ref, *, n_rows, tile_rows):
    """One (batch, spatial-tile) block with integer class labels.

    pred_ref : (1, C, TS, 128) logits tile (native dtype)
    lab_ref  : (1, TS, 128) integer labels (padding uses an out-of-range value)
    out_ref  : (1, 1, 1, 128) lane-dense TP partial
    """
    x = pred_ref[...]                                    # (1, C, TS, L)
    lab = lab_ref[...].astype(jnp.int32)[:, None, :, :]  # (1, 1, TS, L)
    hit = jax.lax.broadcasted_iota(jnp.int32, x.shape, 1) == lab  # (1,C,TS,L)

    if n_rows % tile_rows:                               # static: ragged last tile
        j = pl.program_id(1)
        row = jax.lax.broadcasted_iota(jnp.int32, (1, 1, tile_rows, LANE), 2)
        valid = (j * tile_rows + row) < n_rows
        x = jnp.where(valid, x, 0)
        hit = jnp.logical_and(hit, valid)

    m = jnp.max(x, axis=1, keepdims=True)
    e = jnp.exp((x - m).astype(jnp.float32))
    denom = jnp.sum(e, axis=1, keepdims=True)
    num_tp = jnp.sum(e * hit.astype(jnp.float32), axis=1, keepdims=True)
    p_tp = num_tp * pl.reciprocal(denom, approx=False)

    out_ref[...] = jnp.sum(p_tp[0, 0], axis=0, keepdims=True).reshape(1, 1, 1, LANE)


def _run_partials(kernel, pred4, extra, extra_spec, TS, n_j, n_rows_out, vmem_limit):
    N, C, _, _ = pred4.shape
    return pl.pallas_call(
        kernel,
        out_shape=jax.ShapeDtypeStruct((N, n_j, n_rows_out, LANE), jnp.float32),
        grid_spec=pltpu.PrefetchScalarGridSpec(
            num_scalar_prefetch=0,
            grid=(N, n_j),
            in_specs=[
                pl.BlockSpec((1, C, TS, LANE), lambda i, j: (i, 0, j, 0)),
                extra_spec,
            ],
            out_specs=pl.BlockSpec((1, 1, n_rows_out, LANE),
                                   lambda i, j: (i, j, 0, 0)),
        ),
        compiler_params=pltpu.CompilerParams(
            # Every grid step writes its own output block -> no accumulator,
            # both axes parallel (megacore / v7x 2-TC sharding).
            dimension_semantics=("parallel", "parallel"),
            vmem_limit_bytes=vmem_limit,
        ),
    )(pred4, extra)


def focal_tversky_loss(predict, targets, smooth=1.0, alpha=0.7, gamma=0.75):
    """predict, targets: (N, C, H, W); targets one-hot or soft. Returns scalar f32."""
    N, C, H, W = predict.shape
    HW = H * W

    pred = predict.reshape(N, C, HW)
    targ = targets.reshape(N, C, HW)

    L = pl.cdiv(HW, LANE)
    lane_pad = L * LANE - HW
    if lane_pad:
        # TODO(synk): handle the ragged last lane-row fully in-kernel (scalar
        # prefetch of the valid pixel count) to avoid this XLA pad copy.
        pred = jnp.pad(pred, ((0, 0), (0, 0), (0, lane_pad)))
        targ = jnp.pad(targ, ((0, 0), (0, 0), (0, lane_pad)))

    pred4 = pred.reshape(N, C, L, LANE)
    targ4 = targ.reshape(N, C, L, LANE)

    TS, n_j, vmem_limit = _choose_tiling(N, C, L, jnp.dtype(predict.dtype).itemsize)
    kernel = functools.partial(_ft_dense_kernel, n_rows=L, tile_rows=TS)
    targ_spec = pl.BlockSpec((1, C, TS, LANE), lambda i, j: (i, 0, j, 0))

    partials = _run_partials(kernel, pred4, targ4, targ_spec, TS, n_j, 2, vmem_limit)
    sums = jnp.sum(partials, axis=(0, 1, 3))             # (2,) = [TP, sum_t]

    TP = sums[0]
    sum_t = sums[1]
    sum_p = jnp.float32(N * HW)        # softmax over C sums to 1 per pixel (exact)
    FP = sum_p - TP                    # sum((1 - t) * p)
    FN = sum_t - TP                    # sum(t * (1 - p))

    beta = 1.0 - alpha
    tversky = (TP + smooth) / (TP + alpha * FN + beta * FP + smooth)
    return (1.0 - tversky) ** gamma


def focal_tversky_loss_from_labels(predict, labels, smooth=1.0, alpha=0.7, gamma=0.75):
    """predict: (N, C, H, W) logits; labels: (N, H, W) integer class ids in [0, C).

    Same loss as focal_tversky_loss with one-hot targets, but the dense
    targets stream never touches HBM (one-hot mask built in-kernel).
    """
    N, C, H, W = predict.shape
    HW = H * W

    pred = predict.reshape(N, C, HW)
    lab = labels.reshape(N, HW)

    L = pl.cdiv(HW, LANE)
    lane_pad = L * LANE - HW
    if lane_pad:
        pred = jnp.pad(pred, ((0, 0), (0, 0), (0, lane_pad)))
        lab = jnp.pad(lab, ((0, 0), (0, lane_pad)), constant_values=C)  # no match

    pred4 = pred.reshape(N, C, L, LANE)
    lab3 = lab.reshape(N, L, LANE)

    TS, n_j, vmem_limit = _choose_tiling(N, C, L, jnp.dtype(predict.dtype).itemsize)
    kernel = functools.partial(_ft_labels_kernel, n_rows=L, tile_rows=TS)
    lab_spec = pl.BlockSpec((1, TS, LANE), lambda i, j: (i, j, 0))

    partials = _run_partials(kernel, pred4, lab3, lab_spec, TS, n_j, 1, vmem_limit)
    TP = jnp.sum(partials)

    total = jnp.float32(N * HW)        # sum_p = sum_t = N*HW (exact identities)
    FP = total - TP
    FN = total - TP
    beta = 1.0 - alpha
    tversky = (TP + smooth) / (TP + alpha * FN + beta * FP + smooth)
    return (1.0 - tversky) ** gamma


def _reference_loss(predict, targets, smooth=1.0, alpha=0.7, gamma=0.75):
    p = jax.nn.softmax(predict.astype(jnp.float32), axis=1).reshape(-1)
    t = targets.astype(jnp.float32).reshape(-1)
    TP = jnp.sum(p * t)
    FP = jnp.sum((1.0 - t) * p)
    FN = jnp.sum(t * (1.0 - p))
    beta = 1.0 - alpha
    tversky = (TP + smooth) / (TP + alpha * FN + beta * FP + smooth)
    return (1.0 - tversky) ** gamma


def _make_case(kp, kl, N, C, H, W):
    predict = jax.random.normal(kp, (N, C, H, W), dtype=jnp.float32)
    labels = jax.random.randint(kl, (N, H, W), 0, C)
    targets = jnp.transpose(jax.nn.one_hot(labels, C, dtype=jnp.float32),
                            (0, 3, 1, 2))                 # NCHW one-hot
    return predict, labels, targets


if __name__ == "__main__":
    key = jax.random.PRNGKey(0)
    k1, k2, k3, k4, k5, k6 = jax.random.split(key, 6)

    # --- test 1: N=2, C=4, 16x16 (HW % 128 == 0, single spatial block) ---
    predict, labels, targets = _make_case(k1, k2, 2, 4, 16, 16)
    ref = _reference_loss(predict, targets)
    loss = jax.block_until_ready(focal_tversky_loss(predict, targets))
    assert jnp.allclose(loss, ref, rtol=1e-5, atol=1e-5), (loss, ref)
    loss_l = jax.block_until_ready(focal_tversky_loss_from_labels(predict, labels))
    assert jnp.allclose(loss_l, ref, rtol=1e-5, atol=1e-5), (loss_l, ref)

    # --- test 2: 20x20 (HW % 128 != 0 -> lane-padding path) ---
    predict, labels, targets = _make_case(k3, k4, 2, 4, 20, 20)
    ref = _reference_loss(predict, targets)
    loss = jax.block_until_ready(focal_tversky_loss(predict, targets))
    assert jnp.allclose(loss, ref, rtol=1e-5, atol=1e-5), (loss, ref)
    loss_l = jax.block_until_ready(focal_tversky_loss_from_labels(predict, labels))
    assert jnp.allclose(loss_l, ref, rtol=1e-5, atol=1e-5), (loss_l, ref)

    # --- test 3: 48x48 -> L=18 rows, TS=16 -> ragged last tile (mask path) ---
    predict, labels, targets = _make_case(k5, k6, 2, 4, 48, 48)
    ref = _reference_loss(predict, targets)
    loss = jax.block_until_ready(focal_tversky_loss(predict, targets))
    assert jnp.allclose(loss, ref, rtol=1e-5, atol=1e-5), (loss, ref)
    loss_l = jax.block_until_ready(focal_tversky_loss_from_labels(predict, labels))
    assert jnp.allclose(loss_l, ref, rtol=1e-5, atol=1e-5), (loss_l, ref)

    print("KERNEL_OK")
</pallas_src>

<mosaic_0001>
module attributes {stable_mosaic.version = 11 : i64} {
  func.func @_ft_dense_kernel(%arg0: i32, %arg1: i32, %arg2: memref<1x4x2x128xf32, #tpu.memory_space<vmem>>, %arg3: memref<1x4x2x128xf32, #tpu.memory_space<vmem>>, %arg4: memref<1x1x2x128xf32, #tpu.memory_space<vmem>>) attributes {dimension_semantics = [#tpu.dimension_semantics<parallel>, #tpu.dimension_semantics<parallel>], iteration_bounds = array<i64: 2, 1>, scalar_prefetch = 0 : i64, scratch_operands = 0 : i64, tpu.core_type = #tpu.core_type<tc>, window_params = [{transform_indices = @transform_0, window_bounds = array<i64: 1, 4, 2, 128>}, {transform_indices = @transform_1, window_bounds = array<i64: 1, 4, 2, 128>}, {transform_indices = @transform_2, window_bounds = array<i64: 1, 1, 2, 128>}]} {
    %c0 = arith.constant 0 : index
    %c0_0 = arith.constant 0 : index
    %c0_1 = arith.constant 0 : index
    %c0_2 = arith.constant 0 : index
    %0 = vector.load %arg2[%c0, %c0_0, %c0_1, %c0_2] : memref<1x4x2x128xf32, #tpu.memory_space<vmem>>, vector<1x4x2x128xf32>
    %c0_3 = arith.constant 0 : index
    %c0_4 = arith.constant 0 : index
    %c0_5 = arith.constant 0 : index
    %c0_6 = arith.constant 0 : index
    %1 = vector.load %arg3[%c0_3, %c0_4, %c0_5, %c0_6] : memref<1x4x2x128xf32, #tpu.memory_space<vmem>>, vector<1x4x2x128xf32>
    %cst = arith.constant dense<0xFF800000> : vector<1x2x128xf32>
    %2 = vector.multi_reduction <maximumf>, %0, %cst [1] : vector<1x4x2x128xf32> to vector<1x2x128xf32>
    %3 = vector.shape_cast %2 : vector<1x2x128xf32> to vector<1x1x2x128xf32>
    %4 = vector.broadcast %3 : vector<1x1x2x128xf32> to vector<1x4x2x128xf32>
    %5 = arith.subf %0, %4 : vector<1x4x2x128xf32>
    %6 = math.exp %5 : vector<1x4x2x128xf32>
    %cst_7 = arith.constant dense<0.000000e+00> : vector<1x2x128xf32>
    %7 = vector.multi_reduction <add>, %6, %cst_7 [1] : vector<1x4x2x128xf32> to vector<1x2x128xf32>
    %8 = vector.shape_cast %7 : vector<1x2x128xf32> to vector<1x1x2x128xf32>
    %9 = arith.mulf %6, %1 : vector<1x4x2x128xf32>
    %cst_8 = arith.constant dense<0.000000e+00> : vector<1x2x128xf32>
    %10 = vector.multi_reduction <add>, %9, %cst_8 [1] : vector<1x4x2x128xf32> to vector<1x2x128xf32>
    %11 = vector.shape_cast %10 : vector<1x2x128xf32> to vector<1x1x2x128xf32>
    %cst_9 = arith.constant dense<0.000000e+00> : vector<1x2x128xf32>
    %12 = vector.multi_reduction <add>, %1, %cst_9 [1] : vector<1x4x2x128xf32> to vector<1x2x128xf32>
    %13 = vector.shape_cast %12 : vector<1x2x128xf32> to vector<1x1x2x128xf32>
    %14 = tpu.reciprocal %8 : vector<1x1x2x128xf32> -> vector<1x1x2x128xf32>
    %15 = arith.mulf %11, %14 : vector<1x1x2x128xf32>
    %16 = vector.shape_cast %15 : vector<1x1x2x128xf32> to vector<2x128xf32>
    %cst_10 = arith.constant dense<0.000000e+00> : vector<128xf32>
    %17 = vector.multi_reduction <add>, %16, %cst_10 [0] : vector<2x128xf32> to vector<128xf32>
    %18 = vector.shape_cast %17 : vector<128xf32> to vector<1x128xf32>
    %19 = vector.shape_cast %13 : vector<1x1x2x128xf32> to vector<2x128xf32>
    %cst_11 = arith.constant dense<0.000000e+00> : vector<128xf32>
    %20 = vector.multi_reduction <add>, %19, %cst_11 [0] : vector<2x128xf32> to vector<128xf32>
    %21 = vector.shape_cast %20 : vector<128xf32> to vector<1x128xf32>
    %22 = tpu.concatenate %18, %21 in 0 : vector<1x128xf32>, vector<1x128xf32> -> vector<2x128xf32>
    %23 = vector.shape_cast %22 : vector<2x128xf32> to vector<1x1x2x128xf32>
    %c0_12 = arith.constant 0 : index
    %c0_13 = arith.constant 0 : index
    %c0_14 = arith.constant 0 : index
    %c0_15 = arith.constant 0 : index
    %24 = vector.load %arg4[%c0_12, %c0_13, %c0_14, %c0_15] : memref<1x1x2x128xf32, #tpu.memory_space<vmem>>, vector<1x1x2x128xf32>
    tpu.vector_store %arg4[%c0_12, %c0_13, %c0_14, %c0_15], %23 {strides = array<i32>} : memref<1x1x2x128xf32, #tpu.memory_space<vmem>>, vector<1x1x2x128xf32>,
    return
  }
  func.func @transform_0(%arg0: i32, %arg1: i32) -> (i32, i32, i32, i32) {
    %c0_i32 = arith.constant 0 : i32
    %c0_i32_0 = arith.constant 0 : i32
    %c0_i32_1 = arith.constant 0 : i32
    return %arg0, %c0_i32, %arg1, %c0_i32_0 : i32, i32, i32, i32
  }
  func.func @transform_1(%arg0: i32, %arg1: i32) -> (i32, i32, i32, i32) {
    %c0_i32 = arith.constant 0 : i32
    %c0_i32_0 = arith.constant 0 : i32
    %c0_i32_1 = arith.constant 0 : i32
    return %arg0, %c0_i32, %arg1, %c0_i32_0 : i32, i32, i32, i32
  }
  func.func @transform_2(%arg0: i32, %arg1: i32) -> (i32, i32, i32, i32) {
    %c0_i32 = arith.constant 0 : i32
    %c0_i32_0 = arith.constant 0 : i32
    %c0_i32_1 = arith.constant 0 : i32
    return %arg0, %arg1, %c0_i32, %c0_i32_0 : i32, i32, i32, i32
  }
}

</mosaic_0001>

<bundles_post_ra>
// kernel: tpu_custom_call.1
= control target key start
LH: loop header
LB: loop body
LE: loop exit
PB: predicated region body
PF: predicated region fallthrough
CT: control target
= control target key end

     0   :  { %7 = vsyncpa [#allocation3], 0  ;;  %s941_s0 = inlined_call_operand.hbm [shape: f32[2,4,2,128], index: 0, kind: input, shape index: {}]   ;;  %s942_s1 = inlined_call_operand.hbm [shape: f32[2,4,2,128], index: 1, kind: input, shape index: {}]   ;;  %s943_s2 = inlined_call_operand.hbm [shape: f32[2,1,2,128], index: 2, kind: output, shape index: {}]  }
   0x1   :  { %9 = vsyncpa [#allocation3 + $0x1], 0 }
   0x2   :  { %10 = vsyncpa [#allocation6], 0 }
   0x3   :  { %12 = vsyncpa [#allocation6 + $0x1], 0 }
   0x4   :  { %13 = vsyncpa [#allocation4], 0 }
   0x5   :  { %15 = vsyncpa [#allocation4 + $0x1], 0  ;;  %s682_s9 = smov 0   ;;  %s684_s10 = smov 0  }
   0x6   :  { %s686_s11 = smov 0   ;;  %s688_s12 = smov 0  }
   0x7   :  { %s690_s13 = smov 0   ;;  %s692_s14 = smov 0  }
   0x8 LB: > { %s415_s15 = sadd.s32 4294967295, %s660_s14   ;;  %s416_s16 = sadd.s32 4294967294, %s660_s14   ;;  %s660_s14 = sphi %s692_s14, %s21_s14   ;;  %s656_s13 = sphi %s690_s13, %s961_s13   ;;  %s652_s12 = sphi %s688_s12, %s960_s12   ;;  %s648_s11 = sphi %s686_s11, %s959_s11   ;;  %s644_s10 = sphi %s684_s10, %s958_s10   ;;  %s640_s9 = sphi %s682_s9, %s957_s9  }
   0x9   : > { %s33_s17 = sadd.s32 1, %s656_s13  ;;  %s42_s18 = sadd.s32 1, %s648_s11 }
   0xa   : > { %p35_p0 = scmp.ge.s32.totalorder %s33_s17, 2  ;;  %p49_p1 = scmp.ne.s32.totalorder %s648_s11, %s644_s10 }
   0xb   : > { %p50_p2 = scmp.eq.s32.totalorder %s660_s14, 0  ;;  %p55_p3 = scmp.ne.s32.totalorder %s644_s10, %s640_s9 }
   0xc   : > { %s963_s17 = smov (%p35_p0, %s33_s17), 0  ;;  %p56_p5 = scmp.eq.s32.totalorder %s415_s15, 0 }
   0xd   : > { %p723_p4 = por %p50_p2, %p49_p1  ;;  %s37_s20 = ssub.s32 %s656_s13, %s963_s17 }
   0xe   : > { %p109_p6 = scmp.eq.s32.totalorder %s415_s15, 1  ;;  %p40_p7 = scmp.eq.s32.totalorder %s37_s20, 0 }
   0xf   : > { %p729_p8 = por %p56_p5, %p55_p3  ;;  %p115_p10 = scmp.eq.s32.totalorder %s416_s16, 1 }
  0x10   : > { %p733_p9 = por %p109_p6, %p49_p1  ;;  %p452_p13 = scmp.lt.s32.totalorder %s660_s14, 2 }
  0x11   : > { %s947_s21 = scalar_select %p729_p8, 1, 0 }
  0x12   : > { %s948_s22 = scalar_select %p733_p9, 1, 0 }
  0x13   : > { %s738_s23 = scalar_select %p40_p7, %s648_s11, %s42_s18  }
  0x14   : > { %p740_p11 = por %p115_p10, %p55_p3  ;;  %s747_s25 = sand.u32 1, %s648_s11  }
  0x15   : > { %s419_s26 = sshll.u32 %s747_s25, 3  ;;  %s433_s27 = sshll.u32 %s656_s13, 7 }
  0x16   : > { %s949_s24 = scalar_select %p740_p11, 1, 0 }
  0x17   : > { %s756_s30 = scalar_lea.hbm %s941_s0, %s433_s27  ;;  %s139_s3 = scalar_lea.vmem [#allocation2], %s419_s26 }
  0x18   : > { %s147_s4 = sshll.u32 %s139_s3, 4  ;;  %p764_p0 = pnand %p452_p13, %p723_p4  ;;  %s760_s4 = int_to_ptr.vmem [resolvable:$true] %s147_s4 }
  0x19   : > { %s136_s6 = scalar_lea.sflag [#allocation3], %s747_s25  ;;  %s514_s7 = scalar_lea.hbm %s756_s30, 128 }
  0x1a   : > { %p515_p2 = scmp.ne.s32.totalorder %s756_s30, %s514_s7  ;;  %p516_p3 = pneg %p764_p0 }
  0x1b   : > { %s519_s16 = scalar_lea.hbm %s941_s0, 256  ;;  %p520_p4 = scmp.lt.u32.totalorder %s756_s30, %s941_s0 }
  0x1c   : > { %p517_p5 = pnand %p516_p3, %p515_p2  ;;  %p521_p7 = scmp.lt.u32.totalorder %s519_s16, %s514_s7 }
  0x1d   : > { %p523_p13 = scmp.lt.u32.totalorder %s514_s7, %s756_s30 }
  0x1e   : > { %p518_p6 = pneg %p517_p5  ;;  %p522_p10 = por %p521_p7, %p520_p4 }
  0x20   : > { %p524_p12 = por %p523_p13, %p522_p10 }
  0x22   : > { %p525_p1 = pnand %p524_p12, %p518_p6 }
  0x24   : > { %528 = shalt.err (!%p525_p1)
}
  0x25   : > { %s529_s20 = scalar_lea.vmem %s760_s4, 128  ;;  %s662_s28 = smov [#allocation2]  }
  0x26   : > { %p530_p2 = scmp.ne.s32.totalorder %s760_s4, %s529_s20  ;;  %s534_s29 = sshll.u32 %s662_s28, 4  ;;  %s535_s29 = int_to_ptr.vmem [resolvable:$false] %s534_s29 }
  0x27   : > { %s536_s3 = scalar_lea.vmem %s535_s29, 256  ;;  %p537_p9 = scmp.lt.s32.totalorder %s760_s4, %s535_s29 }
  0x28   : > { %p532_p5 = pnand %p530_p2, %p516_p3  ;;  %p538_p4 = scmp.lt.s32.totalorder %s536_s3, %s529_s20 }
  0x2a   : > { %p533_p11 = pneg %p532_p5  ;;  %p539_p7 = por %p538_p4, %p537_p9 }
  0x2c   : > { %p540_p10 = pnand %p539_p7, %p533_p11 }
  0x2e   : > { %543 = shalt.err (!%p540_p10)
}
  0x2f   : > { %s663_s7 = smov 32   ;;  %s664_s8 = smov 2  }
  0x30   : > { %444 = dma.hbm_to_vmem [thread:$0]  (!%p764_p0), %s756_s30, 128, %s760_s4, %s136_s6, %s663_s7, %s663_s7, %s664_s8  }
  0x31   : > { %p177_p9 = scmp.lt.s32.totalorder %s660_s14, 3  ;;  %s806_s18 = scalar_lea.hbm %s942_s1, %s433_s27 }
  0x32   : > { %p951_p11 = scmp.ge.s32.totalorder %s660_s14, 1  ;;  %s161_s20 = scalar_lea.vmem [#allocation5], %s419_s26 }
  0x33   : > { %s169_s28 = sshll.u32 %s161_s20, 4  ;;  %s158_s30 = scalar_lea.sflag [#allocation6], %s747_s25  ;;  %s816_s28 = int_to_ptr.vmem [resolvable:$true] %s169_s28 }
  0x34   : > { %p810_p12 = pnand %p951_p11, %p177_p9  ;;  %s544_s4 = scalar_lea.hbm %s806_s18, 128 }
  0x35   : > { %p545_p1 = scmp.ne.s32.totalorder %s806_s18, %s544_s4  ;;  %s549_s29 = scalar_lea.hbm %s942_s1, 256 }
  0x36   : > { %p550_p2 = scmp.lt.u32.totalorder %s806_s18, %s942_s1  ;;  %p551_p5 = scmp.lt.u32.totalorder %s549_s29, %s544_s4 }
  0x37   : > { %p547_p6 = pnand %p545_p1, %p516_p3  ;;  %p553_p7 = scmp.lt.u32.totalorder %s544_s4, %s806_s18 }
  0x38   : > { %p552_p4 = por %p551_p5, %p550_p2 }
  0x39   : > { %p548_p13 = pneg %p547_p6 }
  0x3a   : > { %p554_p10 = por %p553_p7, %p552_p4 }
  0x3c   : > { %p555_p9 = pnand %p554_p10, %p548_p13 }
  0x3e   : > { %558 = shalt.err (!%p555_p9)
}
  0x3f   : > { %s559_s26 = scalar_lea.vmem %s816_s28, 128  ;;  %s665_s16 = smov [#allocation5]  }
  0x40   : > { %p560_p11 = scmp.ne.s32.totalorder %s816_s28, %s559_s26  ;;  %s564_s20 = sshll.u32 %s665_s16, 4  ;;  %s565_s20 = int_to_ptr.vmem [resolvable:$false] %s564_s20 }
  0x41   : > { %s566_s27 = scalar_lea.vmem %s565_s20, 256  ;;  %p567_p8 = scmp.lt.s32.totalorder %s816_s28, %s565_s20 }
  0x42   : > { %p562_p1 = pnand %p560_p11, %p516_p3  ;;  %p568_p2 = scmp.lt.s32.totalorder %s566_s27, %s559_s26 }
  0x44   : > { %p563_p6 = pneg %p562_p1  ;;  %p569_p5 = por %p568_p2, %p567_p8 }
  0x46   : > { %p570_p4 = pnand %p569_p5, %p563_p6 }
  0x48   : > { %573 = shalt.err (!%p570_p4)
}
  0x49   : > { %447 = dma.hbm_to_vmem [thread:$0]  (!%p764_p0), %s806_s18, 128, %s816_s28, %s158_s30, %s663_s7, %s663_s7, %s664_s8  }
  0x4a   : > { %181 = sbr.rel (%p810_p12) target bundleno = 155 (0x9b), region = 28  ;;  %s850_s4 = sand.u32 (!%p810_p12), 1, %s644_s10  }
  0x4b   : > { %s426_s6 = sshll.u32 (!%p810_p12), %s850_s4, 3  ;;  %s184_s29 = scalar_lea.sflag (!%p810_p12), [#allocation3], %s850_s4 }
  0x4c   : > { %s187_s5 = scalar_lea.vmem (!%p810_p12), [#allocation2], %s426_s6  ;;  %p953_p8 = scmp.ne.s32.totalorder (!%p810_p12), %s947_s21, 0 }
  0x51   : > { %627 = dma.done.wait (%p953_p8), %s184_s29, 128  }
  0x52   : > { %629 = vsyncadd (%p953_p8), %s184_s29, 4294967168  ;;  %s193_s25 = scalar_lea.sflag [#allocation6], %s850_s4  ;;  %s859_s7 = scalar_lea.vmem [#allocation5], %s426_s6 }
  0x53   : > { %631 = dma.done.wait (%p953_p8), %s193_s25, 128  }
  0x54   : > { %633 = vsyncadd (%p953_p8), %s193_s25, 4294967168  ;;  %vm230_vm0 = vcmask 1041408   ;;  %v222_v0 = vld [vmem:[%s187_s5] sm:$0x3]  ;;  %v223_v1 = vld [vmem:[%s187_s5 + $0x2] sm:$0x3] }
  0x55   : > { %v224_v2 = vld [vmem:[%s187_s5 + $0x4] sm:$0x3]  ;;  %v225_v3 = vld [vmem:[%s187_s5 + $0x6] sm:$0x3]  ;;  %v231_v4 = vsel %vm230_vm0, %v222_v0, -inf  ;;  %v232_v5 = vsel %vm230_vm0, %v223_v1, -inf }
  0x56   : > { %v233_v6 = vsel %vm230_vm0, %v224_v2, -inf  ;;  %v234_v7 = vsel %vm230_vm0, %v225_v3, -inf  ;;  %v235_v8 = vmax.f32 %v231_v4, %v232_v5  ;;  %v226_v19 = vld [vmem:[%s859_s7] sm:$0x3]  ;;  %v227_v20 = vld [vmem:[%s859_s7 + $0x2] sm:$0x3] }
  0x57   : > { %v236_v9 = vmax.f32 %v233_v6, %v234_v7  ;;  %v268_v21 = vsel %vm230_vm0, %v226_v19, 0.0  ;;  %v269_v22 = vsel %vm230_vm0, %v227_v20, 0.0  ;;  %v228_v23 = vld [vmem:[%s859_s7 + $0x4] sm:$0x3]  ;;  %v229_v27 = vld [vmem:[%s859_s7 + $0x6] sm:$0x3] }
  0x58   : > { %v270_v24 = vadd.f32 %v269_v22, %v268_v21  ;;  %v271_v25 = vsel %vm230_vm0, %v228_v23, 0.0  ;;  %v273_v32 = vsel %vm230_vm0, %v229_v27, 0.0  ;;  %s428_s21 = sshll.u32 %s850_s4, 1  ;;  %s430_s19 = sshll.u32 %s652_s12, 5  ;;  %vm291_vm1 = vcmask 1040384  }
  0x59   : > { %v237_v10 = vmax.f32 %v235_v8, %v236_v9  ;;  %s221_s8 = scalar_lea.vmem [#allocation7], %s428_s21  ;;  %s894_s3 = scalar_lea.hbm %s943_s2, %s430_s19 }
  0x5a   : > { %v272_v28 = vadd.f32 %v271_v25, %v270_v24  ;;  %s309_s18 = sshll.u32 %s221_s8, 4  ;;  %s295_s15 = scalar_lea.sflag [#allocation4], %s850_s4  ;;  %s889_s18 = int_to_ptr.vmem [resolvable:$true] %s309_s18 }
  0x5b   : > { %v238_v11 = vsub.f32 %v222_v0, %v237_v10  ;;  %v239_v12 = vsub.f32 %v223_v1, %v237_v10  ;;  %v240_v13 = vsub.f32 %v224_v2, %v237_v10  ;;  %v241_v14 = vsub.f32 %v225_v3, %v237_v10  ;;  %s574_s26 = scalar_lea.vmem %s889_s18, 32  ;;  %p954_p3 = scmp.ne.s32.totalorder %s948_s22, 0 }
  0x5c   : > { %v274_v40 = vadd.f32 %v273_v32, %v272_v28  ;;  %p575_p0 = scmp.ne.s32.totalorder %s889_s18, %s574_s26  ;;  %s666_s12 = smov [#allocation7]  }
  0x5d   : > { %v242_v15 = vmul.f32 1.442695, %v238_v11  ;;  %v244_v16 = vmul.f32 1.442695, %v239_v12  ;;  %v246_v17 = vmul.f32 1.442695, %v240_v13 }
  0x5e   : > { %v248_v18 = vmul.f32 1.442695, %v241_v14  ;;  %v284_v47 = vsel %vm230_vm0, %v274_v40, 0.0  ;;  %p576_p12 = pnand %p575_p0, %p954_p3  ;;  %s578_s16 = sshll.u32 %s666_s12, 4  ;;  %s579_s16 = int_to_ptr.vmem [resolvable:$false] %s578_s16 }
  0x5f   : > { %504 = vpow2.f32 %v242_v15  ;;  %v285_v50 = vrot.slane %v284_v47, 4  ;;  %s580_s20 = scalar_lea.vmem %s579_s16, 64  ;;  %p581_p7 = scmp.lt.s32.totalorder %s889_s18, %s579_s16 }
  0x60   : > { %506 = vpow2.f32 %v244_v16  ;;  %p577_p13 = pneg %p576_p12  ;;  %p582_p10 = scmp.lt.s32.totalorder %s580_s20, %s574_s26 }
  0x61   : > { %508 = vpow2.f32 %v246_v17  ;;  %v286_v53 = vadd.f32 %v285_v50, %v284_v47 }
  0x62   : > { %510 = vpow2.f32 %v248_v18  ;;  %p583_p9 = por %p582_p10, %p581_p7 }
  0x63   : > { %v287_v56 = vrot.slane %v286_v53, 2 }
  0x64   : > { %p584_p11 = pnand %p583_p9, %p577_p13 }
  0x65   : > { %v288_v60 = vadd.f32 %v287_v56, %v286_v53 }
  0x67   : > { %v289_v63 = vrot.slane %v288_v60, 1 }
  0x69   : > { %v505_v26 = vpop.eup %504  ;;  %v290_v2 = vadd.f32 %v289_v63, %v288_v60 }
  0x6a   : > { %v507_v29 = vpop.eup %506  ;;  %v250_v30 = vsel %vm230_vm0, %v505_v26, 0.0  ;;  %v257_v31 = vmul.f32 %v505_v26, %v226_v19 }
  0x6b   : > { %v509_v33 = vpop.eup %508  ;;  %v251_v34 = vsel %vm230_vm0, %v507_v29, 0.0  ;;  %v258_v35 = vmul.f32 %v507_v29, %v227_v20 }
  0x6c   : > { %v511_v36 = vpop.eup %510  ;;  %v252_v37 = vadd.f32 %v251_v34, %v250_v30  ;;  %v253_v38 = vsel %vm230_vm0, %v509_v33, 0.0  ;;  %v259_v42 = vmul.f32 %v509_v33, %v228_v23  ;;  %v261_v43 = vsel %vm230_vm0, %v257_v31, 0.0 }
  0x6d   : > { %v255_v39 = vsel %vm230_vm0, %v511_v36, 0.0  ;;  %v262_v44 = vsel %vm230_vm0, %v258_v35, 0.0  ;;  %v260_v48 = vmul.f32 %v511_v36, %v229_v27 }
  0x6e   : > { %v254_v41 = vadd.f32 %v253_v38, %v252_v37  ;;  %v263_v46 = vadd.f32 %v262_v44, %v261_v43  ;;  %v264_v49 = vsel %vm230_vm0, %v259_v42, 0.0 }
  0x6f   : > { %v266_v52 = vsel %vm230_vm0, %v260_v48, 0.0 }
  0x70   : > { %v256_v45 = vadd.f32 %v255_v39, %v254_v41  ;;  %v265_v51 = vadd.f32 %v264_v49, %v263_v46 }
  0x72   : > { %512 = vrcp.f32 %v256_v45  ;;  %v267_v54 = vadd.f32 %v266_v52, %v265_v51 }
  0x7c   : > { %v513_v55 = vpop.eup %512 }
  0x7d   : > { %v276_v57 = vmul.f32 %v513_v55, %v267_v54 }
  0x7f   : > { %v277_v58 = vsel %vm230_vm0, %v276_v57, 0.0 }
  0x80   : > { %v278_v59 = vrot.slane %v277_v58, 4 }
  0x82   : > { %v279_v61 = vadd.f32 %v278_v59, %v277_v58 }
  0x84   : > { %v280_v62 = vrot.slane %v279_v61, 2 }
  0x86   : > { %v281_v0 = vadd.f32 %v280_v62, %v279_v61 }
  0x88   : > { %v282_v1 = vrot.slane %v281_v0, 1 }
  0x8a   : > { %v283_v3 = vadd.f32 %v282_v1, %v281_v0 }
  0x8c   : > { %v292_v4 = vsel %vm291_vm1, %v283_v3, %v290_v2 }
  0x8d   : > { %293 = vst [vmem:[%s221_s8] sm:$0x3] %v292_v4 }
  0x8e   : > { %587 = shalt.err (!%p584_p11)
}
  0x8f   : > { %s588_s27 = scalar_lea.hbm %s894_s3, 32  ;;  %s592_s29 = scalar_lea.hbm %s943_s2, 64 }
  0x90   : > { %p589_p1 = scmp.ne.s32.totalorder %s894_s3, %s588_s27  ;;  %p593_p5 = scmp.lt.u32.totalorder %s894_s3, %s943_s2 }
  0x91   : > { %p594_p4 = scmp.lt.u32.totalorder %s592_s29, %s588_s27  ;;  %p596_p0 = scmp.lt.u32.totalorder %s588_s27, %s894_s3 }
  0x92   : > { %p590_p6 = pnand %p589_p1, %p954_p3 }
  0x93   : > { %p595_p8 = por %p594_p4, %p593_p5 }
  0x94   : > { %p591_p2 = pneg %p590_p6 }
  0x95   : > { %p597_p12 = por %p596_p0, %p595_p8 }
  0x97   : > { %p598_p13 = pnand %p597_p12, %p591_p2 }
  0x99   : > { %601 = shalt.err (!%p598_p13)
}
  0x9a   : > { %439 = dma.vmem_to_hbm [thread:$0]  (%p954_p3), %s889_s18, 32, %s894_s3, %s295_s15  }
  0x9b PF: > { %s321_s7 = sand.u32 1, %s640_s9   ;;  %p955_p7 = scmp.ne.s32.totalorder %s949_s24, 0 }
  0x9c   : > { %p956_p10 = scmp.ge.s32.totalorder %s660_s14, 2  ;;  %s322_s21 = scalar_lea.sflag [#allocation4], %s321_s7 }
  0x9e   : > { %p449_p9 = pnand %p956_p10, %p955_p7 }
  0xa0   : > { %635 = dma.done.wait (!%p449_p9), %s322_s21, 32  }
  0xa1   : > { %637 = vsyncadd (!%p449_p9), %s322_s21, 4294967264  ;;  %s21_s14 = sadd.s32 1, %s660_s14   ;;  %s957_s9 = smov %s644_s10 }
  0xa2   : > { %p18_p11 = scmp.ge.s32.totalorder %s21_s14, 4   ;;  %s958_s10 = smov %s648_s11 }
  0xa3   : > { %s959_s11 = smov %s738_s23  ;;  %s960_s12 = smov %s656_s13 }
  0xa4   : > { %s961_s13 = smov %s963_s17  ;;  %20 = sbr.rel (!%p18_p11) target bundleno = 8 (0x8), region = 86 }
  0xab   :  { %327 = vsyncpa [#allocation3], 1 }
  0xac   :  { %329 = vsyncpa [#allocation3 + $0x1], 1 }
  0xad   :  { %330 = vsyncpa [#allocation6], 1 }
  0xae   :  { %332 = vsyncpa [#allocation6 + $0x1], 1 }
  0xaf   :  { %333 = vsyncpa [#allocation4], 1 }
  0xb0   :  { %335 = vsyncpa [#allocation4 + $0x1], 1 }

</bundles_post_ra>
